<compile_context>
chip_gen: v7x
topology: tpu7x:2x2x1
jax: 0.10.0
libtpu: 0.0.40
codegen_flags: <defaults>
</compile_context>

<pallas_src>
import jax
import jax.numpy as jnp
from jax.experimental import pallas as pl
from jax.experimental.pallas import tpu as pltpu


def _mlp2_kernel(xp_ref, w1b_ref, b1t_ref, w2b_ref, b2_ref, o_ref):
    """One grid step: TILE_R packed rows, each holding PACK batch samples."""
    xp = xp_ref[...]                                    # (TILE_R, PACK*IN) bf16/f32
    # fc1 for all PACK interleaved samples at once (block-diagonal W1), f32 acc.
    h = jnp.dot(xp, w1b_ref[...], preferred_element_type=jnp.float32)
    h = jnp.maximum(h + b1t_ref[...], 0.0)              # bias + ReLU (dropout = id)
    # fc2: one tiny MXU pass against the block-diagonal (PACK*HID, PACK) weight
    # (w2 folded in) -> PACK outputs per row instead of an N=1 column.
    y = jnp.dot(h.astype(w2b_ref.dtype), w2b_ref[...],
                preferred_element_type=jnp.float32) + b2_ref[...]   # (TILE_R, PACK)
    o_ref[...] = jax.nn.sigmoid(y)


def _default_vmem_limit_bytes():
    # v7x: 64 MiB VMEM per TensorCore -> cap the scoped limit at 48 MiB.
    # v5e/v6e: 128 MiB physical -> allow 64 MiB so the biggest tiles fit.
    try:
        kind = jax.devices()[0].device_kind.lower()
    except Exception:
        kind = ""
    if "7" in kind:
        return 48 * 1024 * 1024
    return 64 * 1024 * 1024


def mlp2_forward(x, w1, b1, w2, b2, *, tile_b=16384, pack=4, use_bf16=True,
                 vmem_limit_bytes=None):
    """x: (B, 2*EMB_DIM) f32; w1: (2E, 30); b1: (1, 30)/(30,); w2: (1, 30)/(30,);
    b2: (1, 1)/(1,). Returns sigmoid(fc2(relu(fc1(x)))) of shape (B, 1)."""
    B, in_dim = x.shape
    hid = w1.shape[1]
    assert w1.shape == (in_dim, hid)
    assert pack >= 1

    # --- batch packing (no full-array pad in the common case) -----------------
    rem = B % pack
    if rem:
        # Rare path: jnp.pad copies the whole array; only taken when B % pack != 0.
        x = jnp.pad(x, ((0, pack - rem), (0, 0)))
    Bp = x.shape[0]
    # Free, row-major metadata reshape: PACK consecutive samples per 128-lane row.
    xp = x.reshape(Bp // pack, pack * in_dim)

    cdt = jnp.bfloat16 if use_bf16 else jnp.float32
    xp = xp.astype(cdt)

    # --- block-diagonal parameter blocks (built once, VMEM-resident) ----------
    w1b = jax.scipy.linalg.block_diag(*([w1] * pack)).astype(cdt)        # (P*IN, P*HID)
    b1t = jnp.tile(jnp.asarray(b1, jnp.float32).reshape(1, hid), (1, pack))  # (1, P*HID)
    w2_col = jnp.asarray(w2, jnp.float32).reshape(hid, 1)
    w2b = jax.scipy.linalg.block_diag(*([w2_col] * pack)).astype(cdt)    # (P*HID, P)
    b2r = jnp.asarray(b2, jnp.float32).reshape(1, 1)

    # --- tiling ----------------------------------------------------------------
    n_rows = Bp // pack
    if tile_b // pack >= n_rows:
        tile_r = n_rows                    # single block == full array dim
    else:
        tile_r = max(8, (tile_b // pack) // 8 * 8)   # keep sublane alignment
    n_tiles = pl.cdiv(n_rows, tile_r)      # ragged final block handled by Pallas

    if vmem_limit_bytes is None:
        vmem_limit_bytes = _default_vmem_limit_bytes()

    flops = (2 * n_rows * (pack * in_dim) * (pack * hid)
             + 2 * n_rows * (pack * hid) * pack)
    cost = pl.CostEstimate(
        flops=flops,
        transcendentals=n_rows * pack,                     # sigmoid
        bytes_accessed=xp.size * xp.dtype.itemsize         # stream packed x
        + n_rows * pack * 4                                # output
        + (w1b.size + w2b.size) * w1b.dtype.itemsize
        + (b1t.size + 1) * 4,
    )

    out = pl.pallas_call(
        _mlp2_kernel,
        out_shape=jax.ShapeDtypeStruct((n_rows, pack), jnp.float32),
        grid=(n_tiles,),
        in_specs=[
            pl.BlockSpec((tile_r, pack * in_dim), lambda i: (i, 0)),   # stream x tiles
            pl.BlockSpec((pack * in_dim, pack * hid), lambda i: (0, 0)),  # W1 block-diag
            pl.BlockSpec((1, pack * hid), lambda i: (0, 0)),              # b1 tiled
            pl.BlockSpec((pack * hid, pack), lambda i: (0, 0)),           # W2 block-diag
            pl.BlockSpec((1, 1), lambda i: (0, 0)),                       # b2
        ],
        out_specs=pl.BlockSpec((tile_r, pack), lambda i: (i, 0)),
        compiler_params=pltpu.CompilerParams(
            dimension_semantics=("parallel",),      # shard tiles across TCs (v7x)
            vmem_limit_bytes=vmem_limit_bytes,
        ),
        cost_estimate=cost,
    )(xp, w1b, b1t, w2b, b2r)

    # (n_rows, pack) row-major == original batch order -> free reshape back.
    return out.reshape(Bp, 1)[:B]


def mlp2_reference(x, w1, b1, w2, b2):
    h = jnp.maximum(x @ w1 + b1, 0.0)
    return jax.nn.sigmoid(h @ w2.reshape(-1, 1) + b2.reshape(1, 1))


def mlp2_reference_bf16(x, w1, b1, w2, b2):
    # Mirrors the kernel's bf16 storage / f32 accumulation.
    h = jnp.dot(x.astype(jnp.bfloat16), w1.astype(jnp.bfloat16),
                preferred_element_type=jnp.float32) + b1
    h = jnp.maximum(h, 0.0)
    y = jnp.dot(h.astype(jnp.bfloat16), w2.reshape(-1, 1).astype(jnp.bfloat16),
                preferred_element_type=jnp.float32) + b2.reshape(1, 1)
    return jax.nn.sigmoid(y)


if __name__ == "__main__":
    EMB_DIM = 16
    IN_DIM = 2 * EMB_DIM   # 32
    HID = 30
    BATCH = 200            # not a multiple of the tile -> exercises ragged final block

    key = jax.random.PRNGKey(0)
    kx, kw1, kb1, kw2, kb2 = jax.random.split(key, 5)

    x = jax.random.normal(kx, (BATCH, IN_DIM), dtype=jnp.float32)

    # Deterministic parameter init (mimicking nn.Linear's uniform fan-in init).
    bound1 = 1.0 / jnp.sqrt(IN_DIM)
    w1 = jax.random.uniform(kw1, (IN_DIM, HID), jnp.float32, -bound1, bound1)
    b1 = jax.random.uniform(kb1, (1, HID), jnp.float32, -bound1, bound1)
    bound2 = 1.0 / jnp.sqrt(HID)
    w2 = jax.random.uniform(kw2, (1, HID), jnp.float32, -bound2, bound2)  # fc2 weight row
    b2 = jax.random.uniform(kb2, (1, 1), jnp.float32, -bound2, bound2)

    # Small tile here so the demo runs multiple grid steps with a ragged last
    # block (200 rows -> 50 packed rows -> one full block of 32 + one partial).
    # Production should use the large default tile_b=16384.
    out = mlp2_forward(x, w1, b1, w2, b2, tile_b=128)
    out = jax.block_until_ready(out)
    assert out.shape == (BATCH, 1), out.shape

    # Loose check vs. the pure f32 module semantics (bf16-appropriate tolerance).
    ref_f32 = mlp2_reference(x, w1, b1, w2, b2)
    assert jnp.allclose(out, ref_f32, atol=2e-2, rtol=0.0), \
        float(jnp.max(jnp.abs(out - ref_f32)))
    # Tight check vs. a reference that mirrors the kernel's bf16 casts.
    ref_bf16 = mlp2_reference_bf16(x, w1, b1, w2, b2)
    assert jnp.allclose(out, ref_bf16, atol=5e-3, rtol=0.0), \
        float(jnp.max(jnp.abs(out - ref_bf16)))

    print("KERNEL_OK")
</pallas_src>

<mosaic_0001>
module attributes {stable_mosaic.version = 11 : i64} {
  func.func @_mlp2_kernel(%arg0: i32, %arg1: memref<32x128xbf16, #tpu.memory_space<vmem>>, %arg2: memref<128x120xbf16, #tpu.memory_space<vmem>>, %arg3: memref<1x120xf32, #tpu.memory_space<vmem>>, %arg4: memref<120x4xbf16, #tpu.memory_space<vmem>>, %arg5: memref<1x1xf32, #tpu.memory_space<vmem>>, %arg6: memref<32x4xf32, #tpu.memory_space<vmem>>) attributes {dimension_semantics = [#tpu.dimension_semantics<parallel>], iteration_bounds = array<i64: 2>, scalar_prefetch = 0 : i64, scratch_operands = 0 : i64, tpu.core_type = #tpu.core_type<tc>, window_params = [{transform_indices = @transform_0, window_bounds = array<i64: 32, 128>}, {pipeline_mode = #tpu.pipeline_mode<synchronous>, transform_indices = @transform_1, window_bounds = array<i64: 128, 120>}, {pipeline_mode = #tpu.pipeline_mode<synchronous>, transform_indices = @transform_2, window_bounds = array<i64: 1, 120>}, {pipeline_mode = #tpu.pipeline_mode<synchronous>, transform_indices = @transform_3, window_bounds = array<i64: 120, 4>}, {pipeline_mode = #tpu.pipeline_mode<synchronous>, transform_indices = @transform_4, window_bounds = array<i64: 1, 1>}, {transform_indices = @transform_5, window_bounds = array<i64: 32, 4>}]} {
    %c0 = arith.constant 0 : index
    %c0_0 = arith.constant 0 : index
    %0 = vector.load %arg1[%c0, %c0_0] : memref<32x128xbf16, #tpu.memory_space<vmem>>, vector<32x128xbf16>
    %c0_1 = arith.constant 0 : index
    %c0_2 = arith.constant 0 : index
    %1 = vector.load %arg2[%c0_1, %c0_2] : memref<128x120xbf16, #tpu.memory_space<vmem>>, vector<128x120xbf16>
    %cst = arith.constant dense<0.000000e+00> : vector<32x120xf32>
    %2 = tpu.matmul %0, %1, %cst {dimension_numbers = #tpu.dot_dimension_numbers<[1], [0], [0], [1], [0, 0, 1, 1], [], []>} : vector<32x128xbf16>, vector<128x120xbf16>, vector<32x120xf32> -> vector<32x120xf32>
    %c0_3 = arith.constant 0 : index
    %c0_4 = arith.constant 0 : index
    %3 = vector.load %arg3[%c0_3, %c0_4] : memref<1x120xf32, #tpu.memory_space<vmem>>, vector<1x120xf32>
    %4 = vector.broadcast %3 : vector<1x120xf32> to vector<32x120xf32>
    %5 = arith.addf %2, %4 : vector<32x120xf32>
    %cst_5 = arith.constant 0.000000e+00 : f32
    %6 = vector.broadcast %cst_5 : f32 to vector<32x120xf32>
    %7 = arith.maximumf %5, %6 : vector<32x120xf32>
    %8 = arith.truncf %7 : vector<32x120xf32> to vector<32x120xbf16>
    %c0_6 = arith.constant 0 : index
    %c0_7 = arith.constant 0 : index
    %9 = vector.load %arg4[%c0_6, %c0_7] : memref<120x4xbf16, #tpu.memory_space<vmem>>, vector<120x4xbf16>
    %cst_8 = arith.constant dense<0.000000e+00> : vector<32x4xf32>
    %10 = tpu.matmul %8, %9, %cst_8 {dimension_numbers = #tpu.dot_dimension_numbers<[1], [0], [0], [1], [0, 0, 1, 1], [], []>} : vector<32x120xbf16>, vector<120x4xbf16>, vector<32x4xf32> -> vector<32x4xf32>
    %c0_9 = arith.constant 0 : index
    %c0_10 = arith.constant 0 : index
    %11 = vector.load %arg5[%c0_9, %c0_10] : memref<1x1xf32, #tpu.memory_space<vmem>>, vector<1x1xf32>
    %12 = vector.broadcast %11 : vector<1x1xf32> to vector<32x4xf32>
    %13 = arith.addf %10, %12 : vector<32x4xf32>
    %14 = arith.negf %13 : vector<32x4xf32>
    %15 = math.exp %14 : vector<32x4xf32>
    %cst_11 = arith.constant 1.000000e+00 : f32
    %16 = vector.broadcast %cst_11 : f32 to vector<32x4xf32>
    %17 = arith.addf %16, %15 : vector<32x4xf32>
    %18 = arith.divf %16, %17 : vector<32x4xf32>
    %c0_12 = arith.constant 0 : index
    %c0_13 = arith.constant 0 : index
    %19 = vector.load %arg6[%c0_12, %c0_13] : memref<32x4xf32, #tpu.memory_space<vmem>>, vector<32x4xf32>
    tpu.vector_store %arg6[%c0_12, %c0_13], %18 {strides = array<i32>} : memref<32x4xf32, #tpu.memory_space<vmem>>, vector<32x4xf32>,
    return
  }
  func.func @transform_0(%arg0: i32) -> (i32, i32) {
    %c0_i32 = arith.constant 0 : i32
    %c0_i32_0 = arith.constant 0 : i32
    return %arg0, %c0_i32 : i32, i32
  }
  func.func @transform_1(%arg0: i32) -> (i32, i32) {
    %c0_i32 = arith.constant 0 : i32
    %c0_i32_0 = arith.constant 0 : i32
    %c0_i32_1 = arith.constant 0 : i32
    return %c0_i32, %c0_i32_0 : i32, i32
  }
  func.func @transform_2(%arg0: i32) -> (i32, i32) {
    %c0_i32 = arith.constant 0 : i32
    %c0_i32_0 = arith.constant 0 : i32
    %c0_i32_1 = arith.constant 0 : i32
    return %c0_i32, %c0_i32_0 : i32, i32
  }
  func.func @transform_3(%arg0: i32) -> (i32, i32) {
    %c0_i32 = arith.constant 0 : i32
    %c0_i32_0 = arith.constant 0 : i32
    %c0_i32_1 = arith.constant 0 : i32
    return %c0_i32, %c0_i32_0 : i32, i32
  }
  func.func @transform_4(%arg0: i32) -> (i32, i32) {
    %c0_i32 = arith.constant 0 : i32
    %c0_i32_0 = arith.constant 0 : i32
    %c0_i32_1 = arith.constant 0 : i32
    return %c0_i32, %c0_i32_0 : i32, i32
  }
  func.func @transform_5(%arg0: i32) -> (i32, i32) {
    %c0_i32 = arith.constant 0 : i32
    %c0_i32_0 = arith.constant 0 : i32
    return %arg0, %c0_i32 : i32, i32
  }
}

</mosaic_0001>

<bundles_post_ra>
// kernel: tpu_custom_call.1
= control target key start
LH: loop header
LB: loop body
LE: loop exit
PB: predicated region body
PF: predicated region fallthrough
CT: control target
= control target key end

     0   :  { %s1468_s0 = inlined_call_operand.hbm [shape: bf16[50,128], index: 0, kind: input, shape index: {}]   ;;  %s1469_s1 = inlined_call_operand.hbm [shape: bf16[128,120], index: 1, kind: input, shape index: {}]   ;;  %s1470_s2 = inlined_call_operand.hbm [shape: f32[1,120], index: 2, kind: input, shape index: {}]   ;;  %s1471_s3 = inlined_call_operand.hbm [shape: bf16[120,4], index: 3, kind: input, shape index: {}]   ;;  %s1472_s4 = inlined_call_operand.<no memory space> [shape: f32[1,1], index: 4, kind: input, shape index: {}]   ;;  %s1473_s5 = inlined_call_operand.hbm [shape: f32[50,4], index: 5, kind: output, shape index: {}]  }
   0x1   :  { %v10_v0 = vstv %s1472_s4 }
   0x2   :  { %11 = vst [vmem:[#allocation2] sm:$0x1] %v10_v0 }
   0x3   :  { %12 = vsyncpa [#allocation4], 0 }
   0x4   :  { %14 = vsyncpa [#allocation4 + $0x1], 0 }
   0x5   :  { %15 = vsyncpa [#allocation7], 0 }
   0x6   :  { %16 = vsyncpa [#allocation10], 0 }
   0x7   :  { %17 = vsyncpa [#allocation5], 0 }
   0x8   :  { %19 = vsyncpa [#allocation5 + $0x1], 0  ;;  %s1189_s20 = smov 0   ;;  %s1191_s21 = smov 0  }
   0x9   :  { %s1193_s22 = smov 0   ;;  %s1195_s23 = smov 0  }
   0xa LB: > { %s1210_s4 = sadd.s32 4294967295, %s1142_s23   ;;  %s727_s24 = sadd.s32 4294967294, %s1142_s23   ;;  %s1142_s23 = sphi %s1195_s23, %s1500_s23   ;;  %s1138_s22 = sphi %s1193_s22, %s1499_s22   ;;  %s1134_s21 = sphi %s1191_s21, %s1498_s21   ;;  %s1130_s20 = sphi %s1189_s20, %s1497_s20  }
   0xb   : > { %s1214_s25 = sadd.s32 1, %s1142_s23   ;;  %s32_s26 = sadd.s32 1, %s1138_s22 }
   0xc   : > { %s29_s27 = ssub.s32 %s1142_s23, %s1214_s25  ;;  %p39_p0 = scmp.ne.s32.totalorder %s1138_s22, %s1134_s21 }
   0xd   : > { %p30_p1 = scmp.eq.s32.totalorder %s29_s27, 0  ;;  %p40_p2 = scmp.eq.s32.totalorder %s1142_s23, 0 }
   0xe   : > { %p45_p3 = scmp.ne.s32.totalorder %s1134_s21, %s1130_s20  ;;  %p1474_p4 = scmp.eq.s32.totalorder %s1210_s4, 0 }
   0xf   : > { %s1226_s28 = scalar_select %p30_p1, %s1138_s22, %s32_s26  }
  0x10   : > { %p1228_p5 = por %p40_p2, %p39_p0  ;;  %p1234_p6 = por %p1474_p4, %p45_p3 }
  0x11   : > { %1478 = sst [smem:[#allocation16_spill]] %s1226_s28  ;;  %p153_p7 = scmp.eq.s32.totalorder %s1210_s4, 1 }
  0x12   : > { %s1479_s29 = scalar_select %p1228_p5, 1, 0 }
  0x13   : > { %s1480_s30 = scalar_select %p1234_p6, 1, 0 }
  0x14   : > { %p159_p8 = scmp.eq.s32.totalorder %s727_s24, 1  ;;  %p728_p9 = scmp.ge.s32.totalorder %s1142_s23, 1 }
  0x15   : > { %p166_p10 = scmp.lt.s32.totalorder %s1142_s23, 3  ;;  %p1241_p11 = por %p153_p7, %p39_p0 }
  0x16   : > { %p1245_p12 = por %p159_p8, %p45_p3  ;;  %s1144_s9 = smov [#allocation6]  }
  0x17   : > { %s1481_s6 = scalar_select %p1241_p11, 1, 0 }
  0x18   : > { %s1482_s7 = scalar_select %p1245_p12, 1, 0 }
  0x19   : > { %p1249_p13 = pnand %p728_p9, %p166_p10  ;;  %s178_s10 = sshll.u32 %s1144_s9, 4  ;;  %s179_s10 = int_to_ptr.vmem [resolvable:$true] %s178_s10 }
  0x1a   : > { %s1145_s12 = smov [#allocation8]   ;;  %s956_s16 = scalar_lea.hbm %s1469_s1, 1024 }
  0x1b   : > { %s1483_s8 = scalar_select %p1249_p13, 1, 0 }
  0x1c   : > { %p858_p1 = pneg %p1249_p13  ;;  %s192_s13 = sshll.u32 %s1145_s12, 4  ;;  %s1261_s13 = int_to_ptr.vmem [resolvable:$true] %s192_s13 }
  0x1d   : > { %p957_p0 = scmp.ne.s32.totalorder %s1469_s1, %s956_s16  ;;  %p963_p9 = scmp.lt.u32.totalorder %s956_s16, %s1469_s1 }
  0x1e   : > { %p1257_p2 = pnand %p858_p1, %p1474_p4 }
  0x20   : > { %p1271_p3 = pneg %p1257_p2 }
  0x22   : > { %p959_p7 = pnand %p1271_p3, %p957_p0 }
  0x24   : > { %p960_p8 = pneg %p959_p7 }
  0x26   : > { %p965_p10 = pnand %p963_p9, %p960_p8 }
  0x28   : > { %968 = shalt.err (!%p965_p10)
}
  0x29   : > { %s969_s27 = scalar_lea.vmem %s179_s10, 1024  ;;  %p977_p11 = scmp.lt.s32.totalorder %s179_s10, %s179_s10 }
  0x2a   : > { %p970_p1 = scmp.ne.s32.totalorder %s179_s10, %s969_s27  ;;  %p978_p6 = scmp.lt.s32.totalorder %s969_s27, %s969_s27 }
  0x2c   : > { %p972_p4 = pnand %p970_p1, %p1271_p3  ;;  %p979_p13 = por %p978_p6, %p977_p11 }
  0x2e   : > { %p973_p12 = pneg %p972_p4 }
  0x30   : > { %p980_p5 = pnand %p979_p13, %p973_p12 }
  0x32   : > { %983 = shalt.err (!%p980_p5)
}
  0x33   : > { %s1477_s9 = smov 64   ;;  %s1147_s12 = smov 4  }
  0x34   : > { %861 = dma.hbm_to_vmem [thread:$0]  (!%p1257_p2), %s1469_s1, 1024, %s179_s10, [#allocation7], %s1477_s9, %s1477_s9, %s1147_s12  }
  0x35   : > { %s984_s18 = scalar_lea.hbm %s1470_s2, 16 }
  0x36   : > { %p985_p4 = scmp.ne.s32.totalorder %s1470_s2, %s984_s18  ;;  %p991_p11 = scmp.lt.u32.totalorder %s984_s18, %s1470_s2 }
  0x38   : > { %p987_p5 = pnand %p985_p4, %p1271_p3 }
  0x3a   : > { %p988_p6 = pneg %p987_p5 }
  0x3c   : > { %p993_p12 = pnand %p991_p11, %p988_p6 }
  0x3e   : > { %996 = shalt.err (!%p993_p12)
}
  0x3f   : > { %s997_s10 = scalar_lea.vmem %s1261_s13, 16  ;;  %s1004_s14 = scalar_lea.vmem %s1261_s13, 32 }
  0x40   : > { %p998_p13 = scmp.ne.s32.totalorder %s1261_s13, %s997_s10  ;;  %p1005_p8 = scmp.lt.s32.totalorder %s1261_s13, %s1261_s13 }
  0x41   : > { %p1006_p9 = scmp.lt.s32.totalorder %s1004_s14, %s997_s10 }
  0x42   : > { %p1000_p0 = pnand %p998_p13, %p1271_p3 }
  0x43   : > { %p1007_p10 = por %p1006_p9, %p1005_p8 }
  0x44   : > { %p1001_p7 = pneg %p1000_p0 }
  0x46   : > { %p1008_p1 = pnand %p1007_p10, %p1001_p7 }
  0x48   : > { %1011 = shalt.err (!%p1008_p1)
}
  0x49   : > { %864 = dma.hbm_to_vmem [thread:$0]  (!%p1257_p2), %s1470_s2, 16, %s1261_s13, [#allocation7]  }
  0x4a   : > { %s1148_s16 = smov [#allocation9]   ;;  %s1012_s26 = scalar_lea.hbm %s1471_s3, 960 }
  0x4b   : > { %s202_s17 = sshll.u32 %s1148_s16, 4  ;;  %p1013_p4 = scmp.ne.s32.totalorder %s1471_s3, %s1012_s26  ;;  %s203_s17 = int_to_ptr.vmem [resolvable:$true] %s202_s17 }
  0x4c   : > { %p1019_p11 = scmp.lt.u32.totalorder %s1012_s26, %s1471_s3 }
  0x4d   : > { %p1015_p5 = pnand %p1013_p4, %p1271_p3 }
  0x4f   : > { %p1016_p6 = pneg %p1015_p5 }
  0x51   : > { %p1021_p12 = pnand %p1019_p11, %p1016_p6 }
  0x53   : > { %1024 = shalt.err (!%p1021_p12)
}
  0x54   : > { %s1025_s13 = scalar_lea.vmem %s203_s17, 960  ;;  %p1033_p8 = scmp.lt.s32.totalorder %s203_s17, %s203_s17 }
  0x55   : > { %p1026_p13 = scmp.ne.s32.totalorder %s203_s17, %s1025_s13  ;;  %p1034_p9 = scmp.lt.s32.totalorder %s1025_s13, %s1025_s13 }
  0x57   : > { %p1028_p0 = pnand %p1026_p13, %p1271_p3  ;;  %p1035_p10 = por %p1034_p9, %p1033_p8 }
  0x59   : > { %p1029_p7 = pneg %p1028_p0 }
  0x5b   : > { %p1036_p1 = pnand %p1035_p10, %p1029_p7 }
  0x5d   : > { %1039 = shalt.err (!%p1036_p1)
}
  0x5e   : > { %s1486_s28 = smov 64   ;;  %p732_p4 = scmp.ge.s32.totalorder %s1142_s23, 2 }
  0x5f   : > { %867 = dma.hbm_to_vmem [thread:$0]  (!%p1257_p2), %s1471_s3, 960, %s203_s17, [#allocation10], %s1486_s28, %s1486_s28, %s1147_s12  }
  0x60   : > { %215 = sbr.rel (%p732_p4) target bundleno = 138 (0x8a), region = 32  ;;  %p1487_p3 = scmp.ne.s32.totalorder (!%p732_p4), %s1479_s29, 0 }
  0x67   : > { %218 = sbr.rel (!%p1487_p3) target bundleno = 138 (0x8a), region = 36  ;;  %s219_s19 = sand.u32 (%p1487_p3), 1, %s1138_s22  }
  0x68   : > { %s734_s16 = sshll.u32 (%p1487_p3), %s1142_s23, 2  ;;  %s733_s11 = sshll.u32 (%p1487_p3), %s219_s19, 4 }
  0x69   : > { %s225_s18 = ssub.s32 (%p1487_p3), 7, %s734_s16  ;;  %s1345_s17 = scalar_lea.sflag (%p1487_p3), [#allocation4], %s219_s19 }
  0x6a   : > { %p226_p5 = scmp.lt.s32.totalorder (%p1487_p3), %s225_s18, 4  ;;  %s223_s26 = scalar_lea.vmem (%p1487_p3), [#allocation3], %s733_s11 }
  0x6e   : > { %s1502_s18 = smov (!%p226_p5, %s225_s18), 4 }
  0x6f   : > { %s1342_s24 = sshll.u32 %s1502_s18, 6 }
  0x70   : > { %s230_s12 = ssub.s32 256, %s1342_s24 }
  0x71   : > { %231 = vsyncadd %s1345_s17, %s230_s12  ;;  %p736_p2 = scmp.ne.s32.totalorder %s1342_s24, 0  ;;  %s781_s29 = sshll.u32 %s1142_s23, 8 }
  0x72   : > { %s1353_s14 = scalar_lea.hbm %s1468_s0, %s781_s29  ;;  %s236_s13 = sshll.u32 %s223_s26, 4  ;;  %s1355_s13 = int_to_ptr.vmem [resolvable:$true] %s236_s13 }
  0x73   : > { %s1040_s28 = scalar_lea.hbm %s1353_s14, %s1342_s24  ;;  %s1044_s19 = scalar_lea.hbm %s1468_s0, 448 }
  0x74   : > { %p1041_p6 = scmp.ne.s32.totalorder %s1353_s14, %s1040_s28  ;;  %p1045_p13 = scmp.lt.u32.totalorder %s1353_s14, %s1468_s0 }
  0x75   : > { %p1046_p0 = scmp.lt.u32.totalorder %s1044_s19, %s1040_s28  ;;  %p1048_p8 = scmp.lt.u32.totalorder %s1040_s28, %s1353_s14 }
  0x76   : > { %p1042_p11 = pnand %p1041_p6, %p736_p2 }
  0x77   : > { %p1047_p7 = por %p1046_p0, %p1045_p13 }
  0x78   : > { %p1043_p12 = pneg %p1042_p11 }
  0x79   : > { %p1049_p9 = por %p1048_p8, %p1047_p7 }
  0x7b   : > { %p1050_p10 = pnand %p1049_p9, %p1043_p12 }
  0x7d   : > { %1053 = shalt.err (!%p1050_p10)
}
  0x7e   : > { %s1054_s18 = scalar_lea.vmem %s1355_s13, %s1342_s24  ;;  %s1149_s12 = smov [#allocation3]  }
  0x7f   : > { %p1055_p1 = scmp.ne.s32.totalorder %s1355_s13, %s1054_s18  ;;  %s1058_s26 = sshll.u32 %s1149_s12, 4  ;;  %s1059_s26 = int_to_ptr.vmem [resolvable:$false] %s1058_s26 }
  0x80   : > { %s1060_s29 = scalar_lea.vmem %s1059_s26, 512  ;;  %p1061_p6 = scmp.lt.s32.totalorder %s1355_s13, %s1059_s26 }
  0x81   : > { %p1056_p3 = pnand %p1055_p1, %p736_p2  ;;  %p1062_p11 = scmp.lt.s32.totalorder %s1060_s29, %s1054_s18 }
  0x83   : > { %p1057_p5 = pneg %p1056_p3  ;;  %p1063_p13 = por %p1062_p11, %p1061_p6 }
  0x85   : > { %p1064_p0 = pnand %p1063_p13, %p1057_p5 }
  0x87   : > { %1067 = shalt.err (!%p1064_p0)
}
  0x88   : > { %s1150_s27 = smov 64   ;;  %s1151_s10 = smov 4  }
  0x89   : > { %242 = dma.hbm_to_vmem [thread:$0]  (%p736_p2), %s1353_s14, %s1342_s24, %s1355_s13, %s1345_s17, %s1150_s27, %s1150_s27, %s1151_s10  }
  0x8a PF: > { %p1488_p12 = scmp.ne.s32.totalorder %s1483_s8, 0 }
  0x8b   : > { %s1385_s28 = sand.u32 (!%p1488_p12), 1, %s1134_s21   ;;  %p1489_p7 = scmp.ne.s32.totalorder (!%p1488_p12), %s1480_s30, 0 }
  0x8c   : > { %248 = sbr.rel (%p1488_p12) target bundleno = 681 (0x2a9), region = 40  ;;  %s741_s9 = sshll.u32 (!%p1488_p12), %s1385_s28, 4 }
  0x8d   : > { %s251_s15 = scalar_lea.sflag (!%p1488_p12), [#allocation4], %s1385_s28  ;;  %s1389_s19 = scalar_lea.vmem (!%p1488_p12), [#allocation3], %s741_s9 }
  0x93   : > { %1113 = dma.done.wait (%p1489_p7), %s251_s15, 256  }
  0x94   : > { %1115 = vsyncadd (%p1489_p7), %s251_s15, 4294967040  ;;  %p1490_p2 = scmp.eq.s32.totalorder %s1210_s4, 0 }
  0x96   : > { %1117 = dma.done.wait (%p1490_p2), [#allocation7], 1040   ;;  %p1491_p8 = pmov %p1490_p2 }
  0x97   : > { %p1492_p9 = pmov %p1490_p2 }
  0x98   : > { %1119 = vsyncadd (%p1491_p8), [#allocation7], 4294966256 }
  0x99   : > { %1121 = dma.done.wait (%p1492_p9), [#allocation10], 960   ;;  %p1493_p10 = pmov %p1490_p2 }
  0x9a   : > { %v922_v1 = vld [vmem:[#allocation6] sm:$0xff]   ;;  %v923_v2 = vld [vmem:[#allocation6 + $0x8] sm:$0xff]   ;;  %v924_v3 = vld [vmem:[#allocation6 + $0x10] sm:$0xff]   ;;  %vm523_vm0 = vcmask 1043456   ;;  %v1152_v21 = vmov 0   ;;  %vm516_vm1 = vcmask 982016  }
  0x9b   : > { %1123 = vsyncadd (%p1493_p10), [#allocation10], 4294966336  ;;  %803 = vmatprep.subr.bf16.mxu0 %v922_v1  ;;  %v925_v4 = vld [vmem:[#allocation6 + $0x18] sm:$0xff]   ;;  %v930_v5 = vld [vmem:[%s1389_s19] sm:$0xff]   ;;  %921 = vset.pattern.permute.xlu0 %v1152_v21  ;;  %s745_s30 = sshll.u32 %s1385_s28, 5  ;;  %vm600_vm2 = vcmask 31744  }
  0x9c   : > { %804 = vmatpush3.bf16.msra.mxu0 %v922_v1  ;;  %819 = vmatprep.mubr.bf16.mxu0 %v930_v5  ;;  %v932_v6 = vld [vmem:[#allocation9] sm:$0xff]   ;;  %v933_v7 = vld [vmem:[#allocation9 + $0x8] sm:$0xff]   ;;  %v934_v9 = vld [vmem:[#allocation9 + $0x10] sm:$0xff]   ;;  %s292_s8 = scalar_lea.vmem [#allocation11], %s745_s30  ;;  %s606_s24 = scalar_lea.sflag [#allocation5], %s1385_s28 }
  0x9d   : > { %805 = vmatprep.subr.bf16.mxu0 %v923_v2  ;;  %v926_v8 = vld [vmem:[#allocation6 + $0x20] sm:$0xff]   ;;  %823 = vmatprep.subr.bf16.mxu1 %v932_v6  ;;  %v927_v10 = vld [vmem:[#allocation6 + $0x28] sm:$0xff]   ;;  %v928_v12 = vld [vmem:[#allocation6 + $0x30] sm:$0xff]   ;;  %p1494_p1 = scmp.ne.s32.totalorder %s1481_s6, 0 }
  0x9e   : > { %824 = vmatpush3.bf16.msra.mxu1 %v932_v6  ;;  %v935_v11 = vld [vmem:[#allocation9 + $0x18] sm:$0xff]   ;;  %v936_v13 = vld [vmem:[#allocation9 + $0x20] sm:$0xff]   ;;  %v937_v15 = vld [vmem:[#allocation9 + $0x28] sm:$0xff]   ;;  %s773_s17 = sshll.u32 (%p1494_p1), %s1210_s4, 2 }
  0x9f   : > { %825 = vmatprep.subr.bf16.mxu1 %v933_v7  ;;  %v929_v14 = vld [vmem:[#allocation6 + $0x38] sm:$0xff]   ;;  %v746_v22 = vld [vmem:[#allocation8] ss:$0 sm:$0xff]  ;;  %s614_s14 = ssub.s32 (%p1494_p1), 7, %s773_s17 }
  0xa0   : > { %806 = vmatpush3.bf16.msra.mxu0 %v923_v2  ;;  %v931_v16 = vld [vmem:[%s1389_s19 + $0x8] sm:$0xff]   ;;  %p615_p3 = scmp.lt.s32.totalorder (%p1494_p1), %s614_s14, 4 }
  0xa1   : > { %807 = vmatprep.subr.bf16.mxu0 %v924_v3  ;;  %v938_v17 = vld [vmem:[#allocation9 + $0x30] sm:$0xff]   ;;  %v939_v18 = vld [vmem:[#allocation9 + $0x38] ss:$0 sps:$4 sm:$0xff]   ;;  %v757_v20 = vld [vmem:[#allocation2] ss:$0 sm:$0xff] }
  0xa2   : > { %826 = vmatpush3.bf16.msra.mxu1 %v933_v7  ;;  %v525_v19 = vsel %vm523_vm0, %v939_v18, 0  ;;  %468 = vperm.xlu0 %921, %v757_v20  }
  0xa3   : > { %827 = vmatprep.subr.bf16.mxu1 %v934_v9 }
  0xa4   : > { %808 = vmatpush3.bf16.msra.mxu0 %v924_v3 }
  0xa5   : > { %809 = vmatprep.subr.bf16.mxu0 %v925_v4 }
  0xa6   : > { %828 = vmatpush3.bf16.msra.mxu1 %v934_v9 }
  0xa7   : > { %829 = vmatprep.subr.bf16.mxu1 %v935_v11 }
  0xa8   : > { %810 = vmatpush3.bf16.msra.mxu0 %v925_v4 }
  0xa9   : > { %811 = vmatprep.subr.bf16.mxu0 %v926_v8 }
  0xaa   : > { %830 = vmatpush3.bf16.msra.mxu1 %v935_v11 }
  0xab   : > { %831 = vmatprep.subr.bf16.mxu1 %v936_v13 }
  0xac   : > { %812 = vmatpush3.bf16.msra.mxu0 %v926_v8 }
  0xad   : > { %813 = vmatprep.subr.bf16.mxu0 %v927_v10 }
  0xae   : > { %832 = vmatpush3.bf16.msra.mxu1 %v936_v13 }
  0xaf   : > { %833 = vmatprep.subr.bf16.mxu1 %v937_v15 }
  0xb0   : > { %814 = vmatpush3.bf16.msra.mxu0 %v927_v10 }
  0xb1   : > { %815 = vmatprep.subr.bf16.mxu0 %v928_v12 }
  0xb2   : > { %834 = vmatpush3.bf16.msra.mxu1 %v937_v15 }
  0xb3   : > { %835 = vmatprep.subr.bf16.mxu1 %v938_v17 }
  0xb4   : > { %816 = vmatpush3.bf16.msra.mxu0 %v928_v12 }
  0xb5   : > { %817 = vmatprep.subr.bf16.mxu0 %v929_v14 }
  0xb6   : > { %836 = vmatpush3.bf16.msra.mxu1 %v938_v17 }
  0xb7   : > { %843 = vmatprep.subr.msk.bf16.mxu1 %vm523_vm0, %v939_v18 }
  0xb8   : > { %818 = vmatpush3.bf16.msra.mxu0 %v929_v14 }
  0xba   : > { %838 = vmatpush3.bf16.msra.mxu1 %v525_v19 }
  0xbb   : > { %820 = vmatmul.mubr.bf16.vlgmr.msra.gmra.mrb[0].mxu0 %v931_v16 }
 0x121   : > { %v469_v37 = vpop.permute.xlu0 %468 }
 0x18e   : > { %v821_v23 = vpop.f32.mrb[0].mxu0 }
 0x18f   : > { %v434_v24 = vadd.f32 %v821_v23, %v746_v22  ;;  %v425_v25 = vpop.f32.mrb[1].mxu0 }
 0x190   : > { %v426_v26 = vadd.f32 %v746_v22, %v425_v25  ;;  %v822_v27 = vpop.f32.mrb[2].mxu0 }
 0x191   : > { %v437_v28 = vadd.f32 %v822_v27, %v746_v22  ;;  %v428_v29 = vpop.f32.mrb[3].mxu0  ;;  %v442_v31 = vmax.f32 %v434_v24, 0.0 }
 0x192   : > { %v429_v30 = vadd.f32 %v746_v22, %v428_v29  ;;  %v440_v33 = vmax.f32 %v426_v26, 0.0 }
 0x193   : > { %v443_v32 = vmax.f32 %v437_v28, 0.0 }
 0x194   : > { %v441_v34 = vmax.f32 %v429_v30, 0.0 }
 0x195   : > { %v445_v35 = vpack.c.bf16 %v443_v32, %v442_v31 }
 0x196   : > { %v444_v36 = vpack.c.bf16 %v441_v34, %v440_v33 }
 0x198   : > { %839 = vmatprep.mubr.msk.bf16.mxu1 %vm516_vm1, %v444_v36 }
 0x199   : > { %840 = vmatmul.mubr.msk.bf16.vlgmr.msra.gmra.mrb[0].mxu1 %vm516_vm1, %v445_v35 }
 0x26c   : > { %v841_v38 = vpop.f32.mrb[0].mxu1 }
 0x26d   : > { %v570_v39 = vadd.f32 %v841_v38, %v469_v37  ;;  %v561_v40 = vpop.f32.mrb[1].mxu1 }
 0x26e   : > { %v562_v41 = vadd.f32 %v561_v40, %v469_v37  ;;  %v842_v42 = vpop.f32.mrb[2].mxu1 }
 0x26f   : > { %v770_v43 = vmul.f32 -1.442695, %v570_v39  ;;  %v573_v44 = vadd.f32 %v842_v42, %v469_v37  ;;  %v564_v45 = vpop.f32.mrb[3].mxu1 }
 0x270   : > { %v768_v46 = vmul.f32 -1.442695, %v562_v41  ;;  %v565_v47 = vadd.f32 %v564_v45, %v469_v37 }
 0x271   : > { %940 = vpow2.f32 %v770_v43  ;;  %v771_v48 = vmul.f32 -1.442695, %v573_v44 }
 0x272   : > { %942 = vpow2.f32 %v768_v46  ;;  %v769_v49 = vmul.f32 -1.442695, %v565_v47 }
 0x273   : > { %944 = vpow2.f32 %v771_v48 }
 0x274   : > { %946 = vpow2.f32 %v769_v49 }
 0x27b   : > { %v941_v50 = vpop.eup %940 }
 0x27c   : > { %v943_v51 = vpop.eup %942  ;;  %v590_v52 = vadd.f32 1.0, %v941_v50 }
 0x27d   : > { %v945_v53 = vpop.eup %944  ;;  %v588_v54 = vadd.f32 1.0, %v943_v51 }
 0x27e   : > { %v947_v55 = vpop.eup %946  ;;  %948 = vrcp.f32 %v590_v52  ;;  %v591_v56 = vadd.f32 1.0, %v945_v53 }
 0x27f   : > { %950 = vrcp.f32 %v588_v54  ;;  %v589_v57 = vadd.f32 1.0, %v947_v55 }
 0x280   : > { %952 = vrcp.f32 %v591_v56 }
 0x281   : > { %954 = vrcp.f32 %v589_v57 }
 0x286   : > { %612 = sbr.rel (!%p1494_p1) target bundleno = 681 (0x2a9), region = 60 }
 0x288   : > { %v949_v58 = vpop.eup %948 }
 0x289   : > { %v951_v59 = vpop.eup %950  ;;  %603 = vst.msk [vmem:[%s292_s8 + $0x10] sm:$0xff] %vm600_vm2, %v949_v58 }
 0x28a   : > { %v953_v60 = vpop.eup %952  ;;  %601 = vst.msk [vmem:[%s292_s8] sm:$0xff] %vm600_vm2, %v951_v59 }
 0x28b   : > { %v955_v61 = vpop.eup %954  ;;  %604 = vst.msk [vmem:[%s292_s8 + $0x18] sm:$0xff] %vm600_vm2, %v953_v60 }
 0x28c   : > { %602 = vst.msk [vmem:[%s292_s8 + $0x8] sm:$0xff] %vm600_vm2, %v955_v61 }
 0x28d   : > { %s1504_s14 = smov (!%p615_p3, %s614_s14), 4 }
 0x28e   : > { %s1410_s13 = sshll.u32 %s1504_s14, 7 }
 0x28f   : > { %s619_s16 = ssub.s32 512, %s1410_s13 }
 0x290   : > { %620 = vsyncadd %s606_s24, %s619_s16  ;;  %p775_p5 = scmp.ne.s32.totalorder %s1410_s13, 0  ;;  %s782_s11 = sshll.u32 %s1210_s4, 9 }
 0x291   : > { %s1420_s12 = scalar_lea.hbm %s1473_s5, %s782_s11  ;;  %s625_s26 = sshll.u32 %s292_s8, 4  ;;  %s1422_s26 = int_to_ptr.vmem [resolvable:$true] %s625_s26 }
 0x292   : > { %s1068_s29 = scalar_lea.vmem %s1422_s26, %s1410_s13  ;;  %s1153_s27 = smov [#allocation11]  }
 0x293   : > { %p1069_p6 = scmp.ne.s32.totalorder %s1422_s26, %s1068_s29  ;;  %s1072_s10 = sshll.u32 %s1153_s27, 4  ;;  %s1073_s10 = int_to_ptr.vmem [resolvable:$false] %s1072_s10 }
 0x294   : > { %s1074_s4 = scalar_lea.vmem %s1073_s10, 1024  ;;  %p1075_p0 = scmp.lt.s32.totalorder %s1422_s26, %s1073_s10 }
 0x295   : > { %p1070_p11 = pnand %p1069_p6, %p775_p5  ;;  %p1076_p12 = scmp.lt.s32.totalorder %s1074_s4, %s1068_s29 }
 0x297   : > { %p1071_p13 = pneg %p1070_p11  ;;  %p1077_p7 = por %p1076_p12, %p1075_p0 }
 0x299   : > { %p1078_p2 = pnand %p1077_p7, %p1071_p13 }
 0x29b   : > { %1081 = shalt.err (!%p1078_p2)
}
 0x29c   : > { %s1082_s9 = scalar_lea.hbm %s1420_s12, %s1410_s13  ;;  %s1086_s30 = scalar_lea.hbm %s1473_s5, 896 }
 0x29d   : > { %p1083_p8 = scmp.ne.s32.totalorder %s1420_s12, %s1082_s9  ;;  %p1087_p1 = scmp.lt.u32.totalorder %s1420_s12, %s1473_s5 }
 0x29e   : > { %p1088_p3 = scmp.lt.u32.totalorder %s1086_s30, %s1082_s9  ;;  %p1090_p11 = scmp.lt.u32.totalorder %s1082_s9, %s1420_s12 }
 0x29f   : > { %p1084_p9 = pnand %p1083_p8, %p775_p5 }
 0x2a0   : > { %p1089_p6 = por %p1088_p3, %p1087_p1 }
 0x2a1   : > { %p1085_p10 = pneg %p1084_p9 }
 0x2a2   : > { %p1091_p13 = por %p1090_p11, %p1089_p6 }
 0x2a4   : > { %p1092_p0 = pnand %p1091_p13, %p1085_p10 }
 0x2a6   : > { %1095 = shalt.err (!%p1092_p0)
}
 0x2a7   : > { %s1154_s14 = smov 128   ;;  %s1155_s16 = smov 8  }
 0x2a8   : > { %631 = dma.vmem_to_hbm [thread:$0]  (%p775_p5), %s1422_s26, %s1410_s13, %s1420_s12, %s606_s24, %s1154_s14, %s1154_s14, %s1155_s16  }
 0x2a9 PF: > { %s640_s11 = sand.u32 1, %s1130_s20   ;;  %p1495_p12 = scmp.ne.s32.totalorder %s1482_s7, 0 }
 0x2aa   : > { %s641_s6 = scalar_lea.sflag [#allocation5], %s640_s11 }
 0x2ab   : > { %p869_p7 = pnand %p732_p4, %p1495_p12 }
 0x2ad   : > { %1125 = dma.done.wait (!%p869_p7), %s641_s6, 512  }
 0x2ae   : > { %1127 = vsyncadd (!%p869_p7), %s641_s6, 4294966784  ;;  %s1496_s18 = sld [smem:[#allocation16_spill]]  ;;  %p22_p2 = scmp.ge.s32.totalorder %s1214_s25, 4  }
 0x2af   : > { %s1497_s20 = smov %s1134_s21  ;;  %s1498_s21 = smov %s1138_s22 }
 0x2b0   : > { %s1500_s23 = smov %s1214_s25  ;;  %24 = sbr.rel (!%p22_p2) target bundleno = 10 (0xa), region = 97 }
 0x2b4   : > { %s1499_s22 = smov %s1496_s18 }
 0x2b7   :  { %646 = vsyncpa [#allocation4], 1 }
 0x2b8   :  { %648 = vsyncpa [#allocation4 + $0x1], 1 }
 0x2b9   :  { %649 = vsyncpa [#allocation7], 1 }
 0x2ba   :  { %650 = vsyncpa [#allocation10], 1 }
 0x2bb   :  { %651 = vsyncpa [#allocation5], 1 }
 0x2bc   :  { %653 = vsyncpa [#allocation5 + $0x1], 1 }

</bundles_post_ra>
